<compile_context>
chip_gen: v6e
topology: v6e:2x2x1
jax: 0.10.0
libtpu: 0.0.40
codegen_flags: <defaults>
</compile_context>

<pallas_src>
import functools

import jax
import jax.numpy as jnp
from jax import lax
from jax.experimental import pallas as pl
from jax.experimental.pallas import tpu as pltpu

LANES = 128
TILE_ROWS_MAX = 4096   # 4096*128*4B = 2 MiB per f32 input tile
STRIP_ROWS = 128       # rows per inner strip (64 KiB f32 live data)
PAD_PRED = -1e4        # finite sentinel: bce == 0 and w == 0 exactly (no NaN/inf)


def _round_up(x, m):
    return -(-x // m) * m


def _tile_partial_sums(pred_ref, true_ref, *, rows, strip, alpha, gamma):
    """Fold the first `rows` rows of this tile into two (8, LANES) f32 sums."""
    num_full = rows // strip
    rem = rows - num_full * strip          # multiple of 8 by construction

    def strip_sums(off, srows):
        x = pred_ref[pl.ds(off, srows), :].astype(jnp.float32)   # logits
        y = true_ref[pl.ds(off, srows), :].astype(jnp.float32)   # targets
        # One exp per element, shared between BCE and sigmoid (EUP saver).
        e = jnp.exp(-jnp.abs(x))                                 # exp(-|x|)
        # Numerically stable BCEWithLogits: max(x,0) - x*y + log1p(exp(-|x|))
        bce = jnp.maximum(x, 0.0) - x * y + jnp.log1p(e)
        inv = pl.reciprocal(1.0 + e, approx=False)               # 1/(1+exp(-|x|))
        p = jnp.where(x >= 0.0, inv, e * inv)                    # sigmoid(x)
        d = jnp.abs(p - y)
        if gamma == 1.5:
            d_pow = d * jnp.sqrt(d)                              # |d|**1.5, no pow
        elif gamma == 2.0:
            d_pow = d * d
        elif gamma == 1.0:
            d_pow = d
        else:
            d_pow = d ** gamma
        w = jnp.where(y > 0.0, y, alpha * d_pow)
        # Fold the strip to (8, LANES) via pure vreg adds (no cross-lane work).
        return (bce.reshape(srows // 8, 8, LANES).sum(axis=0),
                w.reshape(srows // 8, 8, LANES).sum(axis=0))

    zeros = jnp.zeros((8, LANES), jnp.float32)
    if num_full == 1:
        acc_b, acc_w = strip_sums(0, strip)                      # static offsets
    elif num_full > 1:
        def body(j, carry):
            acc_b, acc_w = carry
            off = pl.multiple_of(j * strip, 8)
            sb, sw = strip_sums(off, strip)
            return acc_b + sb, acc_w + sw
        unroll = num_full if num_full <= 8 else 4
        acc_b, acc_w = lax.fori_loop(0, num_full, body, (zeros, zeros),
                                     unroll=unroll)
    else:
        acc_b, acc_w = zeros, zeros
    if rem:
        sb, sw = strip_sums(num_full * strip, rem)
        acc_b = acc_b + sb
        acc_w = acc_w + sw
    return acc_b, acc_w


def _vf_loss_kernel(pred_ref, true_ref, out_ref, *, tile_rows, tail_rows,
                    strip, alpha, gamma):
    def emit(rows):
        acc_b, acc_w = _tile_partial_sums(
            pred_ref, true_ref, rows=rows, strip=strip, alpha=alpha, gamma=gamma)
        out_ref[0] = acc_b
        out_ref[1] = acc_w

    if tail_rows == tile_rows:
        # Grid divides the array evenly: one unconditional, mask-free path.
        emit(tile_rows)
    else:
        # Last grid block is partial: process only its valid rows (static),
        # never reading the Pallas out-of-bounds region. No masking anywhere.
        i = pl.program_id(0)
        last = pl.num_programs(0) - 1

        @pl.when(i != last)
        def _():
            emit(tile_rows)

        @pl.when(i == last)
        def _():
            emit(tail_rows)


def vf_loss(pred, true, gamma=1.5, alpha=0.25, reduction="mean"):
    """VFLoss(nn.BCEWithLogitsLoss()) forward. pred/true: same-shape arrays."""
    assert pred.shape == true.shape
    n_total = pred.size

    flat_pred = pred.reshape(-1)
    flat_true = true.reshape(-1)

    rows = _round_up(-(-n_total // LANES), 8)     # rows rounded to the (8,128) tile
    pad = rows * LANES - n_total
    if pad:
        # Rare ragged case (n % 1024 != 0): one padded copy. Sentinels give
        # exactly-zero bce and focal weight, so the kernel needs no mask.
        flat_pred = jnp.pad(flat_pred, (0, pad), constant_values=PAD_PRED)
        flat_true = jnp.pad(flat_true, (0, pad), constant_values=0)
    pred2d = flat_pred.reshape(rows, LANES)       # native dtype; upcast in-kernel
    true2d = flat_true.reshape(rows, LANES)

    tile_rows = min(TILE_ROWS_MAX, rows)
    num_tiles = -(-rows // tile_rows)             # last tile may be partial
    tail_rows = rows - (num_tiles - 1) * tile_rows
    strip = min(STRIP_ROWS, tile_rows)

    kernel = functools.partial(
        _vf_loss_kernel, tile_rows=tile_rows, tail_rows=tail_rows,
        strip=strip, alpha=float(alpha), gamma=float(gamma))

    partials = pl.pallas_call(
        kernel,
        out_shape=jax.ShapeDtypeStruct((num_tiles, 2, 8, LANES), jnp.float32),
        grid_spec=pltpu.PrefetchScalarGridSpec(
            num_scalar_prefetch=0,
            grid=(num_tiles,),
            in_specs=[
                pl.BlockSpec((tile_rows, LANES), lambda i: (i, 0)),
                pl.BlockSpec((tile_rows, LANES), lambda i: (i, 0)),
            ],
            out_specs=pl.BlockSpec((None, 2, 8, LANES),
                                   lambda i: (i, 0, 0, 0)),
        ),
        compiler_params=pltpu.CompilerParams(
            dimension_semantics=("parallel",)),   # shards grid across TCs on v7x
    )(pred2d, true2d)

    # One fused reduction over the tiny (num_tiles, 2, 8, 128) partials.
    sums = jnp.sum(partials, axis=(0, 2, 3))
    mean_bce = sums[0] / jnp.float32(n_total)     # wrapped BCE reduction is 'mean'
    sum_w = sums[1]

    if reduction == "mean":
        return mean_bce * (sum_w / jnp.float32(n_total))
    elif reduction == "sum":
        return mean_bce * sum_w
    else:
        # TODO(synk): reduction='none' (elementwise output) not implemented;
        # the canonical wrapped nn.BCEWithLogitsLoss() default is 'mean'.
        raise NotImplementedError("reduction must be 'mean' or 'sum'")


def _reference_vf_loss(pred, true, gamma=1.5, alpha=0.25):
    """Pure-JAX reference mirroring the PyTorch VFLoss module exactly."""
    pred = pred.astype(jnp.float32)
    true = true.astype(jnp.float32)
    bce = jnp.maximum(pred, 0.0) - pred * true + jnp.log1p(jnp.exp(-jnp.abs(pred)))
    loss = jnp.mean(bce)                          # loss_fcn.reduction = 'mean'
    pred_prob = jax.nn.sigmoid(pred)
    focal_weight = (true * (true > 0.0).astype(jnp.float32)
                    + alpha * jnp.power(jnp.abs(pred_prob - true), gamma)
                    * (true <= 0.0).astype(jnp.float32))
    return jnp.mean(loss * focal_weight)          # self.reduction == 'mean'


if __name__ == "__main__":
    key = jax.random.PRNGKey(0)
    k1, k2 = jax.random.split(key)

    # NCHW detection-head-style inputs: 2*4*16*16 = 2048 elements (aligned path,
    # no wrapper pad, no in-kernel mask).
    pred = jax.random.normal(k1, (2, 4, 16, 16), dtype=jnp.float32)
    raw = jax.random.uniform(k2, (2, 4, 16, 16), dtype=jnp.float32)
    true = jnp.where(raw > 0.7, raw, 0.0)   # mostly background, some positive IoU

    out = jax.block_until_ready(vf_loss(pred, true, gamma=1.5, alpha=0.25))
    ref = _reference_vf_loss(pred, true, gamma=1.5, alpha=0.25)
    assert jnp.allclose(out, ref, rtol=1e-5, atol=1e-6), (out, ref)

    # Ragged element count (3*5*7 = 105): exercises the sentinel-pad path.
    k3, k4 = jax.random.split(k1)
    pred2 = jax.random.normal(k3, (3, 5, 7), dtype=jnp.float32)
    raw2 = jax.random.uniform(k4, (3, 5, 7), dtype=jnp.float32)
    true2 = jnp.where(raw2 > 0.7, raw2, 0.0)
    out2 = jax.block_until_ready(vf_loss(pred2, true2))
    ref2 = _reference_vf_loss(pred2, true2)
    assert jnp.allclose(out2, ref2, rtol=1e-5, atol=1e-6), (out2, ref2)

    print("KERNEL_OK")
</pallas_src>

<mosaic_0001>
module attributes {stable_mosaic.version = 11 : i64} {
  func.func @_vf_loss_kernel(%arg0: i32, %arg1: memref<16x128xf32, #tpu.memory_space<vmem>>, %arg2: memref<16x128xf32, #tpu.memory_space<vmem>>, %arg3: memref<1x2x8x128xf32, #tpu.memory_space<vmem>>) attributes {dimension_semantics = [#tpu.dimension_semantics<parallel>], iteration_bounds = array<i64: 1>, scalar_prefetch = 0 : i64, scratch_operands = 0 : i64, tpu.core_type = #tpu.core_type<tc>, window_params = [{transform_indices = @transform_0, window_bounds = array<i64: 16, 128>}, {transform_indices = @transform_1, window_bounds = array<i64: 16, 128>}, {transform_indices = @transform_2, window_bounds = array<i64: 1, 2, 8, 128>}]} {
    %c0 = arith.constant 0 : index
    %c0_0 = arith.constant 0 : index
    %0 = vector.load %arg1[%c0, %c0_0] : memref<16x128xf32, #tpu.memory_space<vmem>>, vector<16x128xf32>
    %c0_1 = arith.constant 0 : index
    %c0_2 = arith.constant 0 : index
    %1 = vector.load %arg2[%c0_1, %c0_2] : memref<16x128xf32, #tpu.memory_space<vmem>>, vector<16x128xf32>
    %2 = math.absf %0 : vector<16x128xf32>
    %cst = arith.constant 0.000000e+00 : f32
    %3 = vector.broadcast %cst : f32 to vector<16x128xf32>
    %4 = arith.subf %3, %2 : vector<16x128xf32>
    %5 = math.exp %4 : vector<16x128xf32>
    %cst_3 = arith.constant 0.000000e+00 : f32
    %6 = vector.broadcast %cst_3 : f32 to vector<16x128xf32>
    %7 = arith.maximumf %0, %6 : vector<16x128xf32>
    %8 = arith.mulf %0, %1 : vector<16x128xf32>
    %9 = arith.subf %7, %8 : vector<16x128xf32>
    %10 = math.log1p %5 : vector<16x128xf32>
    %11 = arith.addf %9, %10 : vector<16x128xf32>
    %cst_4 = arith.constant 1.000000e+00 : f32
    %12 = vector.broadcast %cst_4 : f32 to vector<16x128xf32>
    %13 = arith.addf %12, %5 : vector<16x128xf32>
    %14 = tpu.reciprocal %13 : vector<16x128xf32> -> vector<16x128xf32>
    %cst_5 = arith.constant 0.000000e+00 : f32
    %15 = vector.broadcast %cst_5 : f32 to vector<16x128xf32>
    %16 = arith.cmpf oge, %0, %15 : vector<16x128xf32>
    %17 = arith.mulf %5, %14 : vector<16x128xf32>
    %18 = arith.select %16, %14, %17 : vector<16x128xi1>, vector<16x128xf32>
    %19 = arith.subf %18, %1 : vector<16x128xf32>
    %20 = math.absf %19 : vector<16x128xf32>
    %21 = math.sqrt %20 : vector<16x128xf32>
    %22 = arith.mulf %20, %21 : vector<16x128xf32>
    %cst_6 = arith.constant 0.000000e+00 : f32
    %23 = vector.broadcast %cst_6 : f32 to vector<16x128xf32>
    %24 = arith.cmpf ogt, %1, %23 : vector<16x128xf32>
    %cst_7 = arith.constant 2.500000e-01 : f32
    %25 = vector.broadcast %cst_7 : f32 to vector<16x128xf32>
    %26 = arith.mulf %25, %22 : vector<16x128xf32>
    %27 = arith.select %24, %1, %26 : vector<16x128xi1>, vector<16x128xf32>
    %28 = vector.shape_cast %11 : vector<16x128xf32> to vector<2x8x128xf32>
    %cst_8 = arith.constant dense<0.000000e+00> : vector<8x128xf32>
    %29 = vector.multi_reduction <add>, %28, %cst_8 [0] : vector<2x8x128xf32> to vector<8x128xf32>
    %30 = vector.shape_cast %27 : vector<16x128xf32> to vector<2x8x128xf32>
    %cst_9 = arith.constant dense<0.000000e+00> : vector<8x128xf32>
    %31 = vector.multi_reduction <add>, %30, %cst_9 [0] : vector<2x8x128xf32> to vector<8x128xf32>
    %c0_10 = arith.constant 0 : index
    %c0_11 = arith.constant 0 : index
    %c0_12 = arith.constant 0 : index
    %c0_13 = arith.constant 0 : index
    %32 = vector.load %arg3[%c0_10, %c0_11, %c0_12, %c0_13] : memref<1x2x8x128xf32, #tpu.memory_space<vmem>>, vector<1x1x8x128xf32>
    %33 = vector.shape_cast %32 : vector<1x1x8x128xf32> to vector<8x128xf32>
    %34 = vector.shape_cast %29 : vector<8x128xf32> to vector<1x1x8x128xf32>
    tpu.vector_store %arg3[%c0_10, %c0_11, %c0_12, %c0_13], %34 {strides = array<i32>} : memref<1x2x8x128xf32, #tpu.memory_space<vmem>>, vector<1x1x8x128xf32>,
    %c0_14 = arith.constant 0 : index
    %c1 = arith.constant 1 : index
    %c0_15 = arith.constant 0 : index
    %c0_16 = arith.constant 0 : index
    %35 = vector.load %arg3[%c0_14, %c1, %c0_15, %c0_16] : memref<1x2x8x128xf32, #tpu.memory_space<vmem>>, vector<1x1x8x128xf32>
    %36 = vector.shape_cast %35 : vector<1x1x8x128xf32> to vector<8x128xf32>
    %37 = vector.shape_cast %31 : vector<8x128xf32> to vector<1x1x8x128xf32>
    tpu.vector_store %arg3[%c0_14, %c1, %c0_15, %c0_16], %37 {strides = array<i32>} : memref<1x2x8x128xf32, #tpu.memory_space<vmem>>, vector<1x1x8x128xf32>,
    return
  }
  func.func @transform_0(%arg0: i32) -> (i32, i32) {
    %c0_i32 = arith.constant 0 : i32
    %c0_i32_0 = arith.constant 0 : i32
    return %arg0, %c0_i32 : i32, i32
  }
  func.func @transform_1(%arg0: i32) -> (i32, i32) {
    %c0_i32 = arith.constant 0 : i32
    %c0_i32_0 = arith.constant 0 : i32
    return %arg0, %c0_i32 : i32, i32
  }
  func.func @transform_2(%arg0: i32) -> (i32, i32, i32, i32) {
    %c0_i32 = arith.constant 0 : i32
    %c0_i32_0 = arith.constant 0 : i32
    %c0_i32_1 = arith.constant 0 : i32
    %c0_i32_2 = arith.constant 0 : i32
    return %arg0, %c0_i32, %c0_i32_0, %c0_i32_1 : i32, i32, i32, i32
  }
}

</mosaic_0001>

<bundles_post_ra>
// kernel: tpu_custom_call.1
= control target key start
LH: loop header
LB: loop body
LE: loop exit
PB: predicated region body
PF: predicated region fallthrough
CT: control target
= control target key end

     0   :  { %7 = vsyncpa [#allocation3], 0  ;;  %s268_s0 = inlined_call_operand.hbm [shape: f32[16,128], index: 0, kind: input, shape index: {}]   ;;  %s269_s1 = inlined_call_operand.hbm [shape: f32[16,128], index: 1, kind: input, shape index: {}]   ;;  %s270_s2 = inlined_call_operand.hbm [shape: f32[1,2,8,128], index: 2, kind: output, shape index: {}]  }
   0x1   :  { %8 = vsyncpa [#allocation6], 0 }
   0x2   :  { %9 = vsyncpa [#allocation4], 0  ;;  %s224_s9 = smov [#allocation2]  }
   0x3   :  { %s15_s10 = sshll.u32 %s224_s9, 4  ;;  %s16_s10 = int_to_ptr.vmem [resolvable:$true] %s15_s10 }
   0x4   :  { %s166_s11 = scalar_lea.vmem %s16_s10, 256  ;;  %p171_p1 = scmp.lt.s32.totalorder %s16_s10, %s16_s10 }
   0x5   :  { %p167_p0 = scmp.ne.s32.totalorder %s16_s10, %s166_s11  ;;  %p172_p2 = scmp.lt.s32.totalorder %s166_s11, %s166_s11 }
   0x7   :  { %p173_p3 = por %p172_p2, %p171_p1 }
   0x9   :  { %p174_p4 = pnand %p173_p3, %p167_p0 }
   0xb   :  { %177 = shalt.err (!%p174_p4)
}
   0xc   :  { %s225_s12 = smov 128   ;;  %s226_s13 = smov 8  }
   0xd   :  { %21 = dma.hbm_to_vmem [thread:$0]  %s268_s0, 256, %s16_s10, [#allocation3], %s225_s12, %s225_s12, %s226_s13  }
   0xe   :  { %s227_s16 = smov [#allocation5]  }
   0xf   :  { %s27_s17 = sshll.u32 %s227_s16, 4  ;;  %s28_s17 = int_to_ptr.vmem [resolvable:$true] %s27_s17 }
  0x10   :  { %s186_s18 = scalar_lea.vmem %s28_s17, 256  ;;  %p191_p6 = scmp.lt.s32.totalorder %s28_s17, %s28_s17 }
  0x11   :  { %p187_p5 = scmp.ne.s32.totalorder %s28_s17, %s186_s18  ;;  %p192_p7 = scmp.lt.s32.totalorder %s186_s18, %s186_s18 }
  0x13   :  { %p193_p8 = por %p192_p7, %p191_p6 }
  0x15   :  { %p194_p9 = pnand %p193_p8, %p187_p5 }
  0x17   :  { %197 = shalt.err (!%p194_p9)
}
  0x18   :  { %33 = dma.hbm_to_vmem [thread:$0]  %s269_s1, 256, %s28_s17, [#allocation6], %s225_s12, %s225_s12, %s226_s13  }
  0x19   :  { %218 = dma.done.wait [#allocation3], 256  }
  0x1a   :  { %219 = vsyncadd [#allocation3], 4294967040 }
  0x1b   :  { %220 = dma.done.wait [#allocation6], 256  }
  0x1c   :  { %221 = vsyncadd [#allocation6], 4294967040  ;;  %v40_v0 = vld [vmem:[#allocation2] sm:$0xff]  ;;  %v41_v1 = vld [vmem:[#allocation2 + $0x8] sm:$0xff]  ;;  %s228_s0 = smov [#allocation7]  }
  0x1d   :  { %v44_v2 = vand.u32 2147483647, %v40_v0  ;;  %v45_v3 = vand.u32 2147483647, %v41_v1  ;;  %v256_v14 = vld [vmem:[#allocation5] sm:$0xff]  ;;  %v43_v16 = vld [vmem:[#allocation5 + $0x8] sm:$0xff] }
  0x1e   :  { %v52_v17 = vmax.f32 %v40_v0, 0.0  ;;  %v54_v18 = vmul.f32 %v256_v14, %v40_v0  ;;  %v53_v21 = vmax.f32 %v41_v1, 0.0  ;;  %v55_v22 = vmul.f32 %v43_v16, %v41_v1  ;;  %s124_s1 = sshll.u32 %s228_s0, 4  ;;  %s125_s1 = int_to_ptr.vmem [resolvable:$true] %s124_s1 }
  0x1f   :  { %v46_v4 = vsub.f32 0.0, %v44_v2  ;;  %v47_v5 = vsub.f32 0.0, %v45_v3  ;;  %vm82_vm2 = vcmp.ge.f32.partialorder %v40_v0, 0.0  ;;  %vm83_vm3 = vcmp.ge.f32.partialorder %v41_v1, 0.0  ;;  %s198_s21 = scalar_lea.vmem %s125_s1, 256  ;;  %p203_p11 = scmp.lt.s32.totalorder %s125_s1, %s125_s1 }
  0x20   :  { %v56_v26 = vsub.f32 %v52_v17, %v54_v18  ;;  %v57_v29 = vsub.f32 %v53_v21, %v55_v22  ;;  %vm108_vm8 = vcmp.gt.f32.partialorder %v256_v14, 0.0  ;;  %vm109_vm9 = vcmp.gt.f32.partialorder %v43_v16, 0.0  ;;  %p199_p10 = scmp.ne.s32.totalorder %s125_s1, %s198_s21  ;;  %p204_p12 = scmp.lt.s32.totalorder %s198_s21, %s198_s21 }
  0x21   :  { %v48_v6 = vmul.f32 1.442695, %v46_v4  ;;  %v50_v7 = vmul.f32 1.442695, %v47_v5 }
  0x22   :  { %p205_p13 = por %p204_p12, %p203_p11 }
  0x23   :  { %142 = vpow2.f32 %v48_v6 }
  0x24   :  { %144 = vpow2.f32 %v50_v7  ;;  %p206_p0 = pnand %p205_p13, %p199_p10 }
  0x30   :  { %v143_v8 = vpop.eup %142 }
  0x31   :  { %v145_v9 = vpop.eup %144  ;;  %v58_v10 = vadd.f32 1.0, %v143_v8  ;;  %v61_v12 = vmul.f32 -0.5, %v143_v8  ;;  %v64_v19 = vand.u32 2147483647, %v143_v8 }
  0x32   :  { %v67_v11 = vadd.f32 1.0, %v145_v9  ;;  %v70_v13 = vmul.f32 -0.5, %v145_v9  ;;  %v73_v23 = vand.u32 2147483647, %v145_v9 }
  0x33   :  { %146 = vlog2.f32 %v58_v10  ;;  %v62_v15 = vadd.f32 1.0, %v61_v12  ;;  %vm65_vm0 = vcmp.lt.f32.partialorder %v64_v19, 0.0004427343 }
  0x34   :  { %148 = vlog2.f32 %v67_v11  ;;  %v71_v20 = vadd.f32 1.0, %v70_v13  ;;  %vm74_vm1 = vcmp.lt.f32.partialorder %v73_v23, 0.0004427343 }
  0x35   :  { %150 = vrcp.f32 %v58_v10  ;;  %v63_v24 = vmul.f32 %v143_v8, %v62_v15 }
  0x36   :  { %152 = vrcp.f32 %v67_v11  ;;  %v72_v27 = vmul.f32 %v145_v9, %v71_v20 }
  0x40   :  { %v147_v25 = vpop.eup %146 }
  0x41   :  { %v149_v28 = vpop.eup %148  ;;  %v60_v30 = vmul.f32 0.6931472, %v147_v25 }
  0x42   :  { %v151_v31 = vpop.eup %150  ;;  %v69_v32 = vmul.f32 0.6931472, %v149_v28 }
  0x43   :  { %v153_v33 = vpop.eup %152  ;;  %v66_v34 = vsel %vm65_vm0, %v63_v24, %v60_v30  ;;  %v84_v35 = vmul.f32 %v151_v31, %v143_v8 }
  0x44   :  { %v75_v36 = vsel %vm74_vm1, %v72_v27, %v69_v32  ;;  %v76_v37 = vadd.f32 %v66_v34, %v56_v26  ;;  %v85_v38 = vmul.f32 %v153_v33, %v145_v9 }
  0x45   :  { %v77_v39 = vadd.f32 %v75_v36, %v57_v29  ;;  %v86_v40 = vsel %vm82_vm2, %v151_v31, %v84_v35 }
  0x46   :  { %v87_v41 = vsel %vm83_vm3, %v153_v33, %v85_v38  ;;  %v88_v42 = vsub.f32 %v86_v40, %v256_v14 }
  0x47   :  { %v89_v43 = vsub.f32 %v87_v41, %v43_v16  ;;  %v114_v44 = vadd.f32 %v77_v39, %v76_v37 }
  0x48   :  { %v90_v45 = vand.u32 2147483647, %v88_v42 }
  0x49   :  { %v91_v46 = vand.u32 2147483647, %v89_v43  ;;  %116 = vst [vmem:[#allocation7] sm:$0xff] %v114_v44 }
  0x4a   :  { %154 = vrsqrt.f32 %v90_v45  ;;  %vm94_vm4 = vcmp.eq.f32.partialorder %v90_v45, inf  ;;  %v97_v48 = vand.u32 2147483648, %v90_v45  ;;  %vm96_vm5 = vcmp.eq.f32.partialorder %v90_v45, 0.0 }
  0x4b   :  { %156 = vrsqrt.f32 %v91_v46  ;;  %vm101_vm6 = vcmp.eq.f32.partialorder %v91_v46, inf  ;;  %v104_v51 = vand.u32 2147483648, %v91_v46  ;;  %vm103_vm7 = vcmp.eq.f32.partialorder %v91_v46, 0.0 }
  0x57   :  { %v155_v47 = vpop.eup %154 }
  0x58   :  { %v157_v49 = vpop.eup %156  ;;  %v93_v50 = vmul.f32 %v155_v47, %v90_v45 }
  0x59   :  { %v100_v52 = vmul.f32 %v157_v49, %v91_v46 }
  0x5a   :  { %v95_v53 = vsel %vm94_vm4, %v90_v45, %v93_v50 }
  0x5b   :  { %v98_v54 = vsel %vm96_vm5, %v97_v48, %v95_v53  ;;  %v102_v55 = vsel %vm101_vm6, %v91_v46, %v100_v52 }
  0x5c   :  { %v105_v56 = vsel %vm103_vm7, %v104_v51, %v102_v55  ;;  %v106_v57 = vmul.f32 %v98_v54, %v90_v45 }
  0x5d   :  { %v107_v58 = vmul.f32 %v105_v56, %v91_v46 }
  0x5e   :  { %v110_v59 = vmul.f32 0.25, %v106_v57 }
  0x5f   :  { %v111_v60 = vmul.f32 0.25, %v107_v58 }
  0x60   :  { %v112_v61 = vsel %vm108_vm8, %v256_v14, %v110_v59 }
  0x61   :  { %v113_v62 = vsel %vm109_vm9, %v43_v16, %v111_v60 }
  0x62   :  { %v115_v63 = vadd.f32 %v113_v62, %v112_v61 }
  0x64   :  { %118 = vst [vmem:[#allocation7 + $0x8] sm:$0xff] %v115_v63 }
  0x65   :  { %209 = shalt.err (!%p206_p0)
}
  0x66   :  { %130 = dma.vmem_to_hbm [thread:$0]  %s125_s1, 256, %s270_s2, [#allocation4], %s225_s12, %s225_s12, %s226_s13  }
  0x67   :  { %222 = dma.done.wait [#allocation4], 256  }
  0x68   :  { %223 = vsyncadd [#allocation4], 4294967040 }
  0x69   :  { %134 = vsyncpa [#allocation3], 1 }
  0x6a   :  { %135 = vsyncpa [#allocation6], 1 }
  0x6b   :  { %136 = vsyncpa [#allocation4], 1 }

</bundles_post_ra>
